<compile_context>
chip_gen: v5e
topology: v5e:2x2
jax: 0.10.0
libtpu: 0.0.40
codegen_flags: <defaults>
</compile_context>

<pallas_src>
import functools

import numpy as np
import jax
import jax.numpy as jnp
from jax.experimental import pallas as pl
from jax.experimental.pallas import tpu as pltpu


def get_k_for_seq_len(seq_len):
    if seq_len == 96:
        return 6
    elif seq_len == 48:
        return 4
    elif seq_len == 24:
        return 2
    elif seq_len == 12:
        return 2
    else:
        raise ValueError(f"Unsupported sequence length: {seq_len}")


def _decomp_kernel(a_ref, x_ref, trend_ref, season_ref, *, sizes, L):
    # a_ref:      (k*L, L)  stacked 0/1 band matrices (f32 or bf16), grid-invariant
    # x_ref:      (L, nt)   time-major input tile (lane dim = padded B*C slice)
    # trend_ref:  (k*L, nt) moving averages for all k pooling sizes
    # season_ref: (k*L, nt) residuals for all k pooling sizes
    x = x_ref[...]
    # Single stacked MXU matmul covering all k pooling sizes, f32 accumulation.
    acc = jnp.dot(a_ref[...], x.astype(a_ref.dtype),
                  preferred_element_type=jnp.float32)
    x_f32 = x.astype(jnp.float32)
    # Static per-size epilogue: scale each L-row block by a compile-time 1/s
    # scalar immediate (count_include_pad=True => always divide by s) and form
    # the residual.  No (k*L, nt) temporaries, no scale-vector broadcast.
    for i, s in enumerate(sizes):
        sl = pl.ds(i * L, L)                                    # static offset
        trend_blk = acc[i * L:(i + 1) * L, :] * (1.0 / float(s))
        trend_ref[sl, :] = trend_blk.astype(trend_ref.dtype)
        season_ref[sl, :] = (x_f32 - trend_blk).astype(season_ref.dtype)


def _pick_n_tile(L, kL, budget_bytes=24 * 1024 * 1024, max_tile=1024):
    """Largest lane tile (multiple of 128) keeping the f32 working set within
    `budget_bytes`: double-buffered x tile + 2 double-buffered output tiles
    + in-kernel temporaries (MXU result ~kL cols, x_f32 + season block ~2L)."""
    per_col_bytes = 4 * (2 * L + 2 * 2 * kL + kL + 2 * L)
    t = (budget_bytes // per_col_bytes) // 128 * 128
    return int(max(128, min(max_tile, t)))


def multi_resolutional_decomp(x, avgpool_sizes, *, use_bf16_matmul=False,
                              n_tile=None, repack_output=True):
    """x: (B, L, C) float array.

    Returns (trend, season):
      repack_output=True  -> each (B, L, C, k), matching the PyTorch module.
      repack_output=False -> each (k, L, B*C) lane-dense, skipping the
                             host-side repack (fusion-friendly).

    use_bf16_matmul=True is recommended on v5e (no f32 MXU path); it casts x
    to bf16 for the matmul (~1e-2 accuracy tradeoff vs. the f32 module).
    """
    B, L, C = x.shape
    k = get_k_for_seq_len(L)
    sizes = tuple(int(s) for s in list(avgpool_sizes)[:k])
    for s in sizes:
        if s % 2 == 0:
            # Even kernel sizes change AvgPool1d output length (L+1) and would
            # break `x - x_rp` in the original PyTorch code too.
            raise ValueError(f"avgpool size {s} must be odd")
    kL = k * L

    # Stacked 0/1 band matrices (exactly representable in bf16).
    idx = np.arange(L)
    bands = [(np.abs(idx[:, None] - idx[None, :]) <= s // 2).astype(np.float32)
             for s in sizes]
    mat_dtype = jnp.bfloat16 if use_bf16_matmul else jnp.float32
    a_all = jnp.asarray(np.concatenate(bands, axis=0), dtype=mat_dtype)  # (kL, L)

    # Lane-dense layout: time-major (L, N) with N = B*C padded to >= 128 lanes.
    N = B * C
    n_pad = max(128, ((N + 127) // 128) * 128)
    nt = n_tile if n_tile is not None else _pick_n_tile(L, kL)
    nt = min(nt, n_pad)
    if n_tile is None and n_pad >= 256:
        # v7x megacore: ensure >= 2 grid steps so both TensorCores get work.
        nt = max(128, min(nt, (n_pad // 2) // 128 * 128))
    n_pad = ((n_pad + nt - 1) // nt) * nt          # grid divides evenly
    grid_n = n_pad // nt

    x_flat = jnp.transpose(x, (1, 0, 2)).reshape(L, N)
    if n_pad != N:
        x_flat = jnp.pad(x_flat, ((0, 0), (0, n_pad - N)))

    kernel = functools.partial(_decomp_kernel, sizes=sizes, L=L)
    trend_flat, season_flat = pl.pallas_call(
        kernel,
        out_shape=(
            jax.ShapeDtypeStruct((kL, n_pad), x.dtype),
            jax.ShapeDtypeStruct((kL, n_pad), x.dtype),
        ),
        grid_spec=pltpu.PrefetchScalarGridSpec(
            num_scalar_prefetch=0,
            grid=(grid_n,),
            in_specs=[
                pl.BlockSpec((kL, L), lambda j: (0, 0)),   # band (tiny, grid-invariant)
                pl.BlockSpec((L, nt), lambda j: (0, j)),   # x lane-tile
            ],
            out_specs=[
                pl.BlockSpec((kL, nt), lambda j: (0, j)),  # trend lane-tile
                pl.BlockSpec((kL, nt), lambda j: (0, j)),  # season lane-tile
            ],
        ),
        compiler_params=pltpu.CompilerParams(
            dimension_semantics=("parallel",),
            vmem_limit_bytes=32 * 1024 * 1024,
        ),
    )(a_all, x_flat)

    if not repack_output:
        return (trend_flat[:, :N].reshape(k, L, N),
                season_flat[:, :N].reshape(k, L, N))

    # Repack to the PyTorch output layout (B, L, C, k).
    # TODO(synk): fused consumers should use repack_output=False (lane-dense
    # (k, L, B*C)) to avoid this extra HBM read/write pass of both outputs.
    def _unflatten(y):
        return jnp.transpose(y[:, :N].reshape(k, L, B, C), (2, 1, 3, 0))

    return _unflatten(trend_flat), _unflatten(season_flat)


def _reference_decomp(x_np, avgpool_sizes):
    """Pure NumPy reference mirroring nn.AvgPool1d(stride=1, padding=s//2)."""
    B, L, C = x_np.shape
    k = get_k_for_seq_len(L)
    trends, seasons = [], []
    for s in avgpool_sizes[:k]:
        pad = s // 2
        xp = np.pad(x_np, ((0, 0), (pad, pad), (0, 0)))
        tr = np.zeros_like(x_np)
        for t in range(L):
            tr[:, t, :] = xp[:, t:t + s, :].sum(axis=1) / float(s)
        trends.append(tr)
        seasons.append(x_np - tr)
    return np.stack(trends, axis=3), np.stack(seasons, axis=3)


if __name__ == "__main__":
    # Deterministic "config": avgpool_sizes as in a TimeMixer-style config.
    avgpool_sizes = [3, 5, 7, 9, 11, 13]
    key = jax.random.PRNGKey(0)

    # (B, L, C), kwargs, tolerance
    cases = [
        ((2, 24, 4), dict(), 1e-5),                      # padded lanes, k=2
        ((2, 96, 4), dict(), 1e-5),                      # k=6 -> stacked M=576
        ((2, 24, 192), dict(n_tile=128), 1e-5),          # multi-step lane grid
        ((2, 24, 4), dict(use_bf16_matmul=True), 2e-2),  # bf16 MXU (v5e) path
    ]
    for (B, L, C), kwargs, tol in cases:
        key, sub = jax.random.split(key)
        x = jax.random.normal(sub, (B, L, C), dtype=jnp.float32)
        trend, season = multi_resolutional_decomp(x, avgpool_sizes, **kwargs)
        trend = np.asarray(jax.block_until_ready(trend))
        season = np.asarray(jax.block_until_ready(season))
        k = get_k_for_seq_len(L)
        ref_trend, ref_season = _reference_decomp(np.asarray(x), avgpool_sizes)
        assert trend.shape == (B, L, C, k) and season.shape == (B, L, C, k)
        assert np.allclose(trend, ref_trend, atol=tol, rtol=tol), ((B, L, C), kwargs)
        assert np.allclose(season, ref_season, atol=tol, rtol=tol), ((B, L, C), kwargs)

    # Lane-dense output path (repack skipped) stays consistent with the
    # repacked path.
    key, sub = jax.random.split(key)
    x = jax.random.normal(sub, (2, 24, 4), dtype=jnp.float32)
    t_ld, s_ld = multi_resolutional_decomp(x, avgpool_sizes, repack_output=False)
    t_ld = np.asarray(jax.block_until_ready(t_ld))
    s_ld = np.asarray(jax.block_until_ready(s_ld))
    ref_trend, ref_season = _reference_decomp(np.asarray(x), avgpool_sizes)
    k = get_k_for_seq_len(24)
    ref_t_ld = np.transpose(ref_trend, (3, 1, 0, 2)).reshape(k, 24, -1)
    ref_s_ld = np.transpose(ref_season, (3, 1, 0, 2)).reshape(k, 24, -1)
    assert np.allclose(t_ld, ref_t_ld, atol=1e-5, rtol=1e-5)
    assert np.allclose(s_ld, ref_s_ld, atol=1e-5, rtol=1e-5)

    print("KERNEL_OK")
</pallas_src>

<mosaic_0001>
module attributes {stable_mosaic.version = 11 : i64} {
  func.func @_decomp_kernel(%arg0: i32, %arg1: memref<48x24xf32, #tpu.memory_space<vmem>>, %arg2: memref<24x128xf32, #tpu.memory_space<vmem>>, %arg3: memref<48x128xf32, #tpu.memory_space<vmem>>, %arg4: memref<48x128xf32, #tpu.memory_space<vmem>>) attributes {dimension_semantics = [#tpu.dimension_semantics<parallel>], iteration_bounds = array<i64: 1>, scalar_prefetch = 0 : i64, scratch_operands = 0 : i64, tpu.core_type = #tpu.core_type<tc>, window_params = [{pipeline_mode = #tpu.pipeline_mode<synchronous>, transform_indices = @transform_0, window_bounds = array<i64: 48, 24>}, {transform_indices = @transform_1, window_bounds = array<i64: 24, 128>}, {transform_indices = @transform_2, window_bounds = array<i64: 48, 128>}, {transform_indices = @transform_3, window_bounds = array<i64: 48, 128>}]} {
    %c0 = arith.constant 0 : index
    %c0_0 = arith.constant 0 : index
    %0 = vector.load %arg2[%c0, %c0_0] : memref<24x128xf32, #tpu.memory_space<vmem>>, vector<24x128xf32>
    %c0_1 = arith.constant 0 : index
    %c0_2 = arith.constant 0 : index
    %1 = vector.load %arg1[%c0_1, %c0_2] : memref<48x24xf32, #tpu.memory_space<vmem>>, vector<48x24xf32>
    %cst = arith.constant dense<0.000000e+00> : vector<48x128xf32>
    %2 = tpu.matmul %1, %0, %cst {dimension_numbers = #tpu.dot_dimension_numbers<[1], [0], [0], [1], [0, 0, 1, 1], [], []>} : vector<48x24xf32>, vector<24x128xf32>, vector<48x128xf32> -> vector<48x128xf32>
    %3 = vector.extract_strided_slice %2 {offsets = [0, 0], sizes = [24, 128], strides = [1, 1]} : vector<48x128xf32> to vector<24x128xf32>
    %cst_3 = arith.constant 0.333333343 : f32
    %4 = vector.broadcast %cst_3 : f32 to vector<24x128xf32>
    %5 = arith.mulf %3, %4 : vector<24x128xf32>
    %c0_4 = arith.constant 0 : index
    %c0_5 = arith.constant 0 : index
    %6 = vector.load %arg3[%c0_4, %c0_5] : memref<48x128xf32, #tpu.memory_space<vmem>>, vector<24x128xf32>
    tpu.vector_store %arg3[%c0_4, %c0_5], %5 {strides = array<i32>} : memref<48x128xf32, #tpu.memory_space<vmem>>, vector<24x128xf32>,
    %7 = arith.subf %0, %5 : vector<24x128xf32>
    %c0_6 = arith.constant 0 : index
    %c0_7 = arith.constant 0 : index
    %8 = vector.load %arg4[%c0_6, %c0_7] : memref<48x128xf32, #tpu.memory_space<vmem>>, vector<24x128xf32>
    tpu.vector_store %arg4[%c0_6, %c0_7], %7 {strides = array<i32>} : memref<48x128xf32, #tpu.memory_space<vmem>>, vector<24x128xf32>,
    %9 = vector.extract_strided_slice %2 {offsets = [24, 0], sizes = [24, 128], strides = [1, 1]} : vector<48x128xf32> to vector<24x128xf32>
    %cst_8 = arith.constant 2.000000e-01 : f32
    %10 = vector.broadcast %cst_8 : f32 to vector<24x128xf32>
    %11 = arith.mulf %9, %10 : vector<24x128xf32>
    %c24 = arith.constant 24 : index
    %c0_9 = arith.constant 0 : index
    %12 = vector.load %arg3[%c24, %c0_9] : memref<48x128xf32, #tpu.memory_space<vmem>>, vector<24x128xf32>
    tpu.vector_store %arg3[%c24, %c0_9], %11 {strides = array<i32>} : memref<48x128xf32, #tpu.memory_space<vmem>>, vector<24x128xf32>,
    %13 = arith.subf %0, %11 : vector<24x128xf32>
    %c24_10 = arith.constant 24 : index
    %c0_11 = arith.constant 0 : index
    %14 = vector.load %arg4[%c24_10, %c0_11] : memref<48x128xf32, #tpu.memory_space<vmem>>, vector<24x128xf32>
    tpu.vector_store %arg4[%c24_10, %c0_11], %13 {strides = array<i32>} : memref<48x128xf32, #tpu.memory_space<vmem>>, vector<24x128xf32>,
    return
  }
  func.func @transform_0(%arg0: i32) -> (i32, i32) {
    %c0_i32 = arith.constant 0 : i32
    %c0_i32_0 = arith.constant 0 : i32
    %c0_i32_1 = arith.constant 0 : i32
    return %c0_i32, %c0_i32_0 : i32, i32
  }
  func.func @transform_1(%arg0: i32) -> (i32, i32) {
    %c0_i32 = arith.constant 0 : i32
    %c0_i32_0 = arith.constant 0 : i32
    return %c0_i32, %arg0 : i32, i32
  }
  func.func @transform_2(%arg0: i32) -> (i32, i32) {
    %c0_i32 = arith.constant 0 : i32
    %c0_i32_0 = arith.constant 0 : i32
    return %c0_i32, %arg0 : i32, i32
  }
  func.func @transform_3(%arg0: i32) -> (i32, i32) {
    %c0_i32 = arith.constant 0 : i32
    %c0_i32_0 = arith.constant 0 : i32
    return %c0_i32, %arg0 : i32, i32
  }
}

</mosaic_0001>

<bundles_post_ra>
// kernel: tpu_custom_call.1
= control target key start
LH: loop header
LB: loop body
LE: loop exit
PB: predicated region body
PF: predicated region fallthrough
CT: control target
= control target key end

     0   :  { %9 = vsyncpa [#allocation3], 0  ;;  %vm24_vm0 = vcmask 195584   ;;  %s288_s0 = inlined_call_operand.vmem [shape: f32[48,24], index: 0, kind: input, shape index: {}]   ;;  %s289_s1 = inlined_call_operand.vmem [shape: f32[24,128], index: 1, kind: input, shape index: {}]   ;;  %s290_s2 = inlined_call_operand.hbm [shape: f32[48,128], index: 2, kind: output, shape index: {0}]   ;;  %s291_s3 = inlined_call_operand.hbm [shape: f32[48,128], index: 3, kind: output, shape index: {1}]  }
   0x1   :  { %v236_v0 = vld [vmem:[%s289_s1 + $0x10] sm:$0xff]  ;;  %v241_v1 = vld [vmem:[%s289_s1 + $0x8] sm:$0xff]  ;;  %v15_v2 = vld [vmem:[%s289_s1] sm:$0xff] }
   0x2   :  { %145 = vmatpush.msra.mxu2 %v236_v0  ;;  %144 = vmatpush.msra.mxu1 %v236_v0  ;;  %v21_v3 = vld [vmem:[%s288_s0 + $0x18] sm:$0xff]  ;;  %v19_v4 = vld [vmem:[%s288_s0 + $0x8] sm:$0xff] }
   0x3   :  { %146 = vmatpush.msra.mxu3 %v236_v0  ;;  %56 = vmatpush.msra.mxu0 %v236_v0 }
   0x4   :  { %148 = vmatpush.msra.mxu2 %v241_v1  ;;  %147 = vmatpush.msra.mxu1 %v241_v1 }
   0x5   :  { %10 = vsyncpa [#allocation5], 0  ;;  %149 = vmatpush.msra.mxu3 %v241_v1  ;;  %57 = vmatpush.msra.mxu0 %v241_v1  ;;  %v23_v5 = vld [vmem:[%s288_s0 + $0x28] sm:$0xff]  ;;  %v18_v6 = vld [vmem:[%s288_s0] sm:$0xff]  ;;  %s108_s5 = sshll.u32 %s290_s2, 4  ;;  %s210_s6 = smov [#allocation4]   ;;  %s109_s5 = int_to_ptr.hbm [resolvable:$true] %s108_s5 }
   0x6   :  { %151 = vmatpush.msra.mxu2 %v15_v2  ;;  %150 = vmatpush.msra.mxu1 %v15_v2  ;;  %v22_v7 = vld [vmem:[%s288_s0 + $0x20] sm:$0xff]  ;;  %v20_v8 = vld [vmem:[%s288_s0 + $0x10] sm:$0xff]  ;;  %s209_s0 = smov [#allocation2]   ;;  %s119_s7 = sshll.u32 %s210_s6, 4  ;;  %s120_s7 = int_to_ptr.vmem [resolvable:$true] %s119_s7 }
   0x7   :  { %141 = vmatmul.msk.f32.vlgmr.msra.gmra.mxu2 %vm24_vm0, %v21_v3  ;;  %139 = vmatmul.msk.f32.vlgmr.msra.gmra.mxu1 %vm24_vm0, %v19_v4  ;;  %s106_s29 = sshll.u32 %s209_s0, 4  ;;  %s121_s10 = sshll.u32 %s291_s3, 4  ;;  %s107_s29 = int_to_ptr.vmem [resolvable:$true] %s106_s29  ;;  %s122_s10 = int_to_ptr.hbm [resolvable:$true] %s121_s10 }
   0x8   :  { %152 = vmatpush.msra.mxu3 %v15_v2  ;;  %58 = vmatpush.msra.mxu0 %v15_v2  ;;  %s211_s2 = smov 128   ;;  %s212_s11 = smov 8  }
   0x9   :  { %143 = vmatmul.msk.f32.vlgmr.msra.gmra.mxu3 %vm24_vm0, %v23_v5  ;;  %138 = vmatmul.msk.f32.vlgmr.msra.gmra.mxu0 %vm24_vm0, %v18_v6 }
   0xf   :  { %142 = vmatmul.msk.f32.gmra.mxu2 %vm24_vm0, %v22_v7  ;;  %140 = vmatmul.msk.f32.gmra.mxu1 %vm24_vm0, %v20_v8 }
  0x84   :  { %v63_v9 = vpop.f32.mrf.mxu1 }
  0x85   :  { %v79_v10 = vmul.f32 0.33333334, %v63_v9 }
  0x86   :  { %v60_v11 = vpop.f32.mrf.mxu0 }
  0x87   :  { %82 = vst [vmem:[#allocation2 + $0x8] sm:$0xff] %v79_v10  ;;  %v85_v12 = vsub.f32 %v241_v1, %v79_v10  ;;  %v78_v13 = vmul.f32 0.33333334, %v60_v11 }
  0x89   :  { %88 = vst [vmem:[#allocation4 + $0x8] sm:$0xff] %v85_v12  ;;  %v84_v14 = vsub.f32 %v15_v2, %v78_v13 }
  0x8a   :  { %v69_v15 = vpop.f32.mrf.mxu2  ;;  %81 = vst [vmem:[#allocation2] sm:$0xff] %v78_v13 }
  0x8b   :  { %v90_v16 = vmul.f32 0.2, %v69_v15  ;;  %87 = vst [vmem:[#allocation4] sm:$0xff] %v84_v14 }
  0x8c   :  { %v66_v17 = vpop.f32.mrf.mxu1  ;;  %v75_v18 = vpop.f32.mrf.mxu3 }
  0x8d   :  { %93 = vst [vmem:[#allocation2 + $0x18] sm:$0xff] %v90_v16  ;;  %v96_v19 = vsub.f32 %v15_v2, %v90_v16  ;;  %v80_v20 = vmul.f32 0.33333334, %v66_v17  ;;  %v92_v21 = vmul.f32 0.2, %v75_v18 }
  0x8f   :  { %99 = vst [vmem:[#allocation4 + $0x18] sm:$0xff] %v96_v19  ;;  %v86_v22 = vsub.f32 %v236_v0, %v80_v20  ;;  %v98_v23 = vsub.f32 %v236_v0, %v92_v21 }
  0x90   :  { %83 = vst [vmem:[#allocation2 + $0x10] sm:$0xff] %v80_v20 }
  0x91   :  { %89 = vst [vmem:[#allocation4 + $0x10] sm:$0xff] %v86_v22 }
  0x92   :  { %v72_v24 = vpop.f32.mrf.mxu2  ;;  %95 = vst [vmem:[#allocation2 + $0x28] sm:$0xff] %v92_v21 }
  0x93   :  { %v91_v25 = vmul.f32 0.2, %v72_v24  ;;  %101 = vst [vmem:[#allocation4 + $0x28] sm:$0xff] %v98_v23 }
  0x95   :  { %94 = vst [vmem:[#allocation2 + $0x20] sm:$0xff] %v91_v25  ;;  %v97_v26 = vsub.f32 %v241_v1, %v91_v25 }
  0x96   :  { %114 = dma.vmem_to_hbm [thread:$0]  %s107_s29, 768, %s109_s5, [#allocation3], %s211_s2, %s211_s2, %s212_s11  }
  0x97   :  { %100 = vst [vmem:[#allocation4 + $0x20] sm:$0xff] %v97_v26 }
  0x98   :  { %127 = dma.vmem_to_hbm [thread:$0]  %s120_s7, 768, %s122_s10, [#allocation5], %s211_s2, %s211_s2, %s212_s11  }
  0x99   :  { %205 = dma.done.wait [#allocation3], 768  }
  0x9a   :  { %206 = vsyncadd [#allocation3], 4294966528 }
  0x9b   :  { %207 = dma.done.wait [#allocation5], 768  }
  0x9c   :  { %208 = vsyncadd [#allocation5], 4294966528 }
  0x9d   :  { %136 = vsyncpa [#allocation3], 1 }
  0x9e   :  { %137 = vsyncpa [#allocation5], 1 }

</bundles_post_ra>
